<compile_context>
chip_gen: v6e
topology: v6e:2x2x1
jax: 0.10.0
libtpu: 0.0.40
codegen_flags: <defaults>
</compile_context>

<pallas_src>
import functools

import jax
import jax.numpy as jnp
from jax.experimental import pallas as pl
from jax.experimental.pallas import tpu as pltpu


def _round_up(v, m):
    return (v + m - 1) // m * m


def _vmem_capacity_bytes():
    """Physical per-TensorCore VMEM; conservative (v7x-sized) fallback."""
    try:
        return int(pltpu.get_tpu_info().vmem_capacity_bytes)
    except Exception:
        return 64 << 20


def _is_multi_tensorcore():
    try:
        return "v7" in jax.devices()[0].device_kind.lower()
    except Exception:
        return False


def _cnn_bilstm_kernel(x_ref, w_in_ref, b_in_ref, w_hid_ref, b1_ref, w2_ref,
                       out_ref, *, DKp, G):
    # One fused MXU matmul produces the conv1d "unfold" and both LSTM
    # directions' i/g/o gate pre-activations (forget path dropped: seq_len==1
    # with zero initial state => f*c_prev == 0 and W_hh @ h_prev == 0).
    # Column layout of z (all offsets are 128-lane aligned):
    #   [0 : DKp)           conv unfold (ReLU'd below)
    #   [DKp : DKp+G)       i gates  [i_fwd | i_bwd | 0-pad]
    #   [DKp+G : DKp+2G)    g gates
    #   [DKp+2G : DKp+3G)   o gates
    z = (jnp.dot(x_ref[...], w_in_ref[...],
                 preferred_element_type=jnp.float32)
         + b_in_ref[...])                                    # (tb, DKp + 3G)

    conv = jnp.maximum(z[:, :DKp], 0.0)
    # sigmoid(x) = 0.5*tanh(x/2) + 0.5; the /2 is folded into the i/o columns
    # of W_in / b_in host-side, so each gate costs one EUP tanh instead of
    # exp + reciprocal.
    i = 0.5 * jnp.tanh(z[:, DKp:DKp + G]) + 0.5
    g = jnp.tanh(z[:, DKp + G:DKp + 2 * G])
    o = 0.5 * jnp.tanh(z[:, DKp + 2 * G:DKp + 3 * G]) + 0.5
    h = o * jnp.tanh(i * g)            # (tb, G); padded lanes are exactly 0

    # FC1: avg-pool(1/D) and w1's conv columns pre-folded into W_hid[:DKp];
    # W_hid[DKp:DKp+G] carries w1's [h_fwd | h_bwd] columns (zero pad rows).
    hidden = (jnp.dot(conv, w_hid_ref[:DKp, :],
                      preferred_element_type=jnp.float32)
              + jnp.dot(h, w_hid_ref[DKp:DKp + G, :],
                        preferred_element_type=jnp.float32)
              + b1_ref[...])
    hidden = jnp.maximum(hidden, 0.0)  # lane Fh is the constant-1 bias lane
    # TODO(synk): Dropout(0.3) is identity here (inference/eval semantics only).
    out_ref[...] = jnp.dot(hidden, w2_ref[...],
                           preferred_element_type=jnp.float32)


def cnn_bilstm_forward(x, p, *, batch_block=None, vmem_limit_bytes=None):
    """x: (B, D) float32; p: dict of PyTorch-layout parameters."""
    x = x.astype(jnp.float32)
    B, D = x.shape
    K, _, ksz = p["conv_w"].shape
    H = p["w_ih_f"].shape[0] // 4
    F = K + 2 * H
    Fh = F // 2
    DK = D * K
    DKp = _round_up(DK, 128)           # conv block, lane aligned
    G = _round_up(2 * H, 128)          # per-gate block, lane aligned
    Fhp = _round_up(Fh + 1, 128)       # fc1 width + constant-1 bias lane

    f32 = lambda a: jnp.asarray(a, jnp.float32)

    # ---------------- host-side weight packing (pure layout glue) -----------
    # Banded "unfold" matrix built directly on the UN-padded x:
    #   conv_flat[b, d*K + k] = sum_j x[b, d + j - ksz//2] * conv_w[k, j]
    conv_w = f32(p["conv_w"][:, 0, :])                       # (K, ksz)
    pad_l = ksz // 2
    r = jnp.arange(D)[:, None, None]
    d = jnp.arange(D)[None, :, None]
    j = jnp.arange(ksz)[None, None, :]
    unfold = (r == d + j - pad_l).astype(jnp.float32)        # (D, D, ksz)
    Wc = jnp.einsum("rdj,kj->rdk", unfold, conv_w).reshape(D, DK)
    Wc = jnp.pad(Wc, ((0, 0), (0, DKp - DK)))

    wf, wb = f32(p["w_ih_f"]), f32(p["w_ih_b"])
    bf = f32(p["b_ih_f"]) + f32(p["b_hh_f"])
    bb = f32(p["b_ih_b"]) + f32(p["b_hh_b"])

    def gate_w(lo, hi, scale):         # -> (D, G) = [fwd | bwd | zero pad]
        w = jnp.concatenate([jnp.transpose(wf[lo:hi]),
                             jnp.transpose(wb[lo:hi])], axis=1) * scale
        return jnp.pad(w, ((0, 0), (0, G - 2 * H)))

    def gate_b(lo, hi, scale):         # -> (G,)
        b = jnp.concatenate([bf[lo:hi], bb[lo:hi]]) * scale
        return jnp.pad(b, (0, G - 2 * H))

    # sigmoid -> tanh rewrite: fold the x0.5 of sigmoid(x)=0.5*tanh(x/2)+0.5
    # into the i / o gate weights and biases.
    Wi, bi = gate_w(0, H, 0.5), gate_b(0, H, 0.5)
    Wg, bg = gate_w(2 * H, 3 * H, 1.0), gate_b(2 * H, 3 * H, 1.0)
    Wo, bo = gate_w(3 * H, 4 * H, 0.5), gate_b(3 * H, 4 * H, 0.5)

    W_in = jnp.concatenate([Wc, Wi, Wg, Wo], axis=1)         # (D, DKp + 3G)
    b_conv = jnp.pad(jnp.tile(f32(p["conv_b"]), D), (0, DKp - DK))
    b_in = jnp.concatenate([b_conv, bi, bg, bo]).reshape(1, DKp + 3 * G)

    # FC1 slab: avg-pool folded into the conv block; LSTM block below it.
    w1 = f32(p["fc1_w"])                                     # (Fh, F)
    avg_w1 = jnp.tile(jnp.transpose(w1[:, :K]), (D, 1)) / D  # (DK, Fh)
    avg_w1 = jnp.pad(avg_w1, ((0, DKp - DK), (0, Fhp - Fh)))
    w1_lstm = jnp.pad(jnp.transpose(w1[:, K:K + 2 * H]),
                      ((0, G - 2 * H), (0, Fhp - Fh)))
    W_hid = jnp.concatenate([avg_w1, w1_lstm], axis=0)       # (DKp + G, Fhp)

    # fc1 bias, plus a constant-1 lane at index Fh that carries fc2's bias
    # through the final matmul (all other padded lanes stay exactly 0).
    b1 = jnp.zeros((Fhp,), jnp.float32).at[:Fh].set(f32(p["fc1_b"]))
    b1 = b1.at[Fh].set(1.0).reshape(1, Fhp)
    w2 = jnp.zeros((Fhp, 1), jnp.float32).at[:Fh, 0].set(f32(p["fc2_w"])[0])
    w2 = w2.at[Fh, 0].set(f32(p["fc2_b"])[0])

    # ---------------- batch tiling (generation-aware VMEM budget) -----------
    vmem_cap = _vmem_capacity_bytes()
    multi_tc = _is_multi_tensorcore()
    if batch_block is None:
        # ~6.5 KB of VMEM activations per batch row -> size the tile to the
        # generation's physical VMEM (v7x: 64 MiB/TC, v5e/v6e: 128 MiB).
        batch_block = 4096 if vmem_cap <= (64 << 20) else 8192

    if B <= batch_block:
        tb = B
        if multi_tc and B >= 16:
            # v7x has 2 TensorCores: keep >=2 grid steps so the "parallel"
            # batch axis actually shards across both cores.
            tb = _round_up(pl.cdiv(B, 2), 8)
    else:
        tb = batch_block
    nb = pl.cdiv(B, tb)

    act_floats = (DKp + 3 * G) + DKp + 4 * G + Fhp   # z + relu/gate/h/hidden temps
    weight_floats = int(W_in.size + b_in.size + W_hid.size + b1.size + w2.size)
    step_bytes = 4 * (tb * (2 * D + 2 + act_floats) + 2 * weight_floats)
    if vmem_limit_bytes is None:
        cap = min(vmem_cap - (16 << 20), 100 << 20)  # headroom below physical
        vmem_limit_bytes = int(max(32 << 20, min(2 * step_bytes, cap)))

    kernel = functools.partial(_cnn_bilstm_kernel, DKp=DKp, G=G)

    def full_spec(a):
        return pl.BlockSpec(a.shape, lambda i: (0, 0))
    # TODO(synk): for much larger D, single-buffer the constant weight specs
    # (pipeline_mode=pl.Buffered(1)) or split DK over an "arbitrary" grid axis
    # so the O(K*D^2) conv-unfold slab still fits v7x's 64 MiB VMEM.

    grid_spec = pltpu.PrefetchScalarGridSpec(
        num_scalar_prefetch=0,
        grid=(nb,),
        in_specs=[
            pl.BlockSpec((tb, D), lambda i: (i, 0)),         # x, blocked over B
            full_spec(W_in), full_spec(b_in),
            full_spec(W_hid), full_spec(b1), full_spec(w2),
        ],
        out_specs=pl.BlockSpec((tb, 1), lambda i: (i, 0)),
    )

    flops = 2 * B * (D * (DKp + 3 * G) + DKp * Fhp + G * Fhp + Fhp)
    transcendentals = 4 * G * B                      # 3 gate tanh + tanh(c)
    bytes_accessed = 4 * (B * D + weight_floats + B)

    return pl.pallas_call(
        kernel,
        out_shape=jax.ShapeDtypeStruct((B, 1), jnp.float32),
        grid_spec=grid_spec,
        compiler_params=pltpu.CompilerParams(
            dimension_semantics=("parallel",),
            vmem_limit_bytes=vmem_limit_bytes),
        cost_estimate=pl.CostEstimate(flops=int(flops),
                                      transcendentals=int(transcendentals),
                                      bytes_accessed=int(bytes_accessed)),
    )(x, W_in, b_in, W_hid, b1, w2)


def init_params(key, input_dim, lstm_hidden_dim=32, kernel_num=16, kernel_size=3):
    ks = jax.random.split(key, 12)
    H, K, F = lstm_hidden_dim, kernel_num, kernel_num + 2 * lstm_hidden_dim
    n = lambda k, shape, s=0.1: (s * jax.random.normal(k, shape)).astype(jnp.float32)
    return {
        "conv_w": n(ks[0], (K, 1, kernel_size)),
        "conv_b": n(ks[1], (K,)),
        "w_ih_f": n(ks[2], (4 * H, input_dim)),
        "b_ih_f": n(ks[3], (4 * H,)),
        "b_hh_f": n(ks[4], (4 * H,)),
        "w_ih_b": n(ks[5], (4 * H, input_dim)),
        "b_ih_b": n(ks[6], (4 * H,)),
        "b_hh_b": n(ks[7], (4 * H,)),
        "fc1_w": n(ks[8], (F // 2, F)),
        "fc1_b": n(ks[9], (F // 2,)),
        "fc2_w": n(ks[10], (1, F // 2)),
        "fc2_b": n(ks[11], (1,)),
    }


def torch_style_reference(x, p):
    """Plain-JAX replica of the PyTorch forward (for verification)."""
    B, D = x.shape
    K = p["conv_w"].shape[0]
    H = p["w_ih_f"].shape[0] // 4
    xpad = jnp.pad(x, ((0, 0), (1, 1)))
    cols = jnp.stack([xpad[:, j:j + D] for j in range(3)], axis=0)     # (3, B, D)
    conv = jnp.einsum("kj,jbd->bkd", p["conv_w"][:, 0, :], cols) \
        + p["conv_b"][None, :, None]
    cnn_out = jnp.mean(jax.nn.relu(conv), axis=2)                      # (B, K)

    def cell(w_ih, b_ih, b_hh):
        gates = x @ w_ih.T + b_ih + b_hh
        i, f, g, o = jnp.split(gates, 4, axis=1)
        c = jax.nn.sigmoid(i) * jnp.tanh(g)          # f * c_prev == 0
        return jax.nn.sigmoid(o) * jnp.tanh(c)

    h_f = cell(p["w_ih_f"], p["b_ih_f"], p["b_hh_f"])
    h_b = cell(p["w_ih_b"], p["b_ih_b"], p["b_hh_b"])
    combined = jnp.concatenate([cnn_out, h_f, h_b], axis=1)
    hid = jax.nn.relu(combined @ p["fc1_w"].T + p["fc1_b"])
    return hid @ p["fc2_w"].T + p["fc2_b"]


if __name__ == "__main__":
    B, D, H, K = 8, 16, 32, 16
    key = jax.random.PRNGKey(0)
    kx, kp = jax.random.split(key)
    x = jax.random.normal(kx, (B, D), dtype=jnp.float32)
    params = init_params(kp, input_dim=D, lstm_hidden_dim=H, kernel_num=K)

    out = jax.block_until_ready(cnn_bilstm_forward(x, params))
    ref = jax.block_until_ready(torch_style_reference(x, params))

    assert out.shape == (B, 1)
    assert jnp.allclose(out, ref, atol=1e-4, rtol=1e-4), (out, ref)
    print("KERNEL_OK")
</pallas_src>

<mosaic_0001>
module attributes {stable_mosaic.version = 11 : i64} {
  func.func @_cnn_bilstm_kernel(%arg0: i32, %arg1: memref<8x16xf32, #tpu.memory_space<vmem>>, %arg2: memref<16x640xf32, #tpu.memory_space<vmem>>, %arg3: memref<1x640xf32, #tpu.memory_space<vmem>>, %arg4: memref<384x128xf32, #tpu.memory_space<vmem>>, %arg5: memref<1x128xf32, #tpu.memory_space<vmem>>, %arg6: memref<128x1xf32, #tpu.memory_space<vmem>>, %arg7: memref<8x1xf32, #tpu.memory_space<vmem>>) attributes {dimension_semantics = [#tpu.dimension_semantics<parallel>], iteration_bounds = array<i64: 1>, scalar_prefetch = 0 : i64, scratch_operands = 0 : i64, tpu.core_type = #tpu.core_type<tc>, window_params = [{transform_indices = @transform_0, window_bounds = array<i64: 8, 16>}, {pipeline_mode = #tpu.pipeline_mode<synchronous>, transform_indices = @transform_1, window_bounds = array<i64: 16, 640>}, {pipeline_mode = #tpu.pipeline_mode<synchronous>, transform_indices = @transform_2, window_bounds = array<i64: 1, 640>}, {pipeline_mode = #tpu.pipeline_mode<synchronous>, transform_indices = @transform_3, window_bounds = array<i64: 384, 128>}, {pipeline_mode = #tpu.pipeline_mode<synchronous>, transform_indices = @transform_4, window_bounds = array<i64: 1, 128>}, {pipeline_mode = #tpu.pipeline_mode<synchronous>, transform_indices = @transform_5, window_bounds = array<i64: 128, 1>}, {transform_indices = @transform_6, window_bounds = array<i64: 8, 1>}]} {
    %c0 = arith.constant 0 : index
    %c0_0 = arith.constant 0 : index
    %0 = vector.load %arg1[%c0, %c0_0] : memref<8x16xf32, #tpu.memory_space<vmem>>, vector<8x16xf32>
    %c0_1 = arith.constant 0 : index
    %c0_2 = arith.constant 0 : index
    %1 = vector.load %arg2[%c0_1, %c0_2] : memref<16x640xf32, #tpu.memory_space<vmem>>, vector<16x640xf32>
    %cst = arith.constant dense<0.000000e+00> : vector<8x640xf32>
    %2 = tpu.matmul %0, %1, %cst {dimension_numbers = #tpu.dot_dimension_numbers<[1], [0], [0], [1], [0, 0, 1, 1], [], []>} : vector<8x16xf32>, vector<16x640xf32>, vector<8x640xf32> -> vector<8x640xf32>
    %c0_3 = arith.constant 0 : index
    %c0_4 = arith.constant 0 : index
    %3 = vector.load %arg3[%c0_3, %c0_4] : memref<1x640xf32, #tpu.memory_space<vmem>>, vector<1x640xf32>
    %4 = vector.broadcast %3 : vector<1x640xf32> to vector<8x640xf32>
    %5 = arith.addf %2, %4 : vector<8x640xf32>
    %6 = vector.extract_strided_slice %5 {offsets = [0, 0], sizes = [8, 256], strides = [1, 1]} : vector<8x640xf32> to vector<8x256xf32>
    %cst_5 = arith.constant 0.000000e+00 : f32
    %7 = vector.broadcast %cst_5 : f32 to vector<8x256xf32>
    %8 = arith.maximumf %6, %7 : vector<8x256xf32>
    %9 = vector.extract_strided_slice %5 {offsets = [0, 256], sizes = [8, 128], strides = [1, 1]} : vector<8x640xf32> to vector<8x128xf32>
    %10 = math.tanh %9 : vector<8x128xf32>
    %cst_6 = arith.constant 5.000000e-01 : f32
    %11 = vector.broadcast %cst_6 : f32 to vector<8x128xf32>
    %12 = arith.mulf %11, %10 : vector<8x128xf32>
    %cst_7 = arith.constant 5.000000e-01 : f32
    %13 = vector.broadcast %cst_7 : f32 to vector<8x128xf32>
    %14 = arith.addf %12, %13 : vector<8x128xf32>
    %15 = vector.extract_strided_slice %5 {offsets = [0, 384], sizes = [8, 128], strides = [1, 1]} : vector<8x640xf32> to vector<8x128xf32>
    %16 = math.tanh %15 : vector<8x128xf32>
    %17 = vector.extract_strided_slice %5 {offsets = [0, 512], sizes = [8, 128], strides = [1, 1]} : vector<8x640xf32> to vector<8x128xf32>
    %18 = math.tanh %17 : vector<8x128xf32>
    %cst_8 = arith.constant 5.000000e-01 : f32
    %19 = vector.broadcast %cst_8 : f32 to vector<8x128xf32>
    %20 = arith.mulf %19, %18 : vector<8x128xf32>
    %cst_9 = arith.constant 5.000000e-01 : f32
    %21 = vector.broadcast %cst_9 : f32 to vector<8x128xf32>
    %22 = arith.addf %20, %21 : vector<8x128xf32>
    %23 = arith.mulf %14, %16 : vector<8x128xf32>
    %24 = math.tanh %23 : vector<8x128xf32>
    %25 = arith.mulf %22, %24 : vector<8x128xf32>
    %c0_10 = arith.constant 0 : index
    %c0_11 = arith.constant 0 : index
    %26 = vector.load %arg4[%c0_10, %c0_11] : memref<384x128xf32, #tpu.memory_space<vmem>>, vector<256x128xf32>
    %cst_12 = arith.constant dense<0.000000e+00> : vector<8x128xf32>
    %27 = tpu.matmul %8, %26, %cst_12 {dimension_numbers = #tpu.dot_dimension_numbers<[1], [0], [0], [1], [0, 0, 1, 1], [], []>} : vector<8x256xf32>, vector<256x128xf32>, vector<8x128xf32> -> vector<8x128xf32>
    %c256 = arith.constant 256 : index
    %c0_13 = arith.constant 0 : index
    %28 = vector.load %arg4[%c256, %c0_13] : memref<384x128xf32, #tpu.memory_space<vmem>>, vector<128x128xf32>
    %cst_14 = arith.constant dense<0.000000e+00> : vector<8x128xf32>
    %29 = tpu.matmul %25, %28, %cst_14 {dimension_numbers = #tpu.dot_dimension_numbers<[1], [0], [0], [1], [0, 0, 1, 1], [], []>} : vector<8x128xf32>, vector<128x128xf32>, vector<8x128xf32> -> vector<8x128xf32>
    %30 = arith.addf %27, %29 : vector<8x128xf32>
    %c0_15 = arith.constant 0 : index
    %c0_16 = arith.constant 0 : index
    %31 = vector.load %arg5[%c0_15, %c0_16] : memref<1x128xf32, #tpu.memory_space<vmem>>, vector<1x128xf32>
    %32 = vector.broadcast %31 : vector<1x128xf32> to vector<8x128xf32>
    %33 = arith.addf %30, %32 : vector<8x128xf32>
    %cst_17 = arith.constant 0.000000e+00 : f32
    %34 = vector.broadcast %cst_17 : f32 to vector<8x128xf32>
    %35 = arith.maximumf %33, %34 : vector<8x128xf32>
    %c0_18 = arith.constant 0 : index
    %c0_19 = arith.constant 0 : index
    %36 = vector.load %arg6[%c0_18, %c0_19] : memref<128x1xf32, #tpu.memory_space<vmem>>, vector<128x1xf32>
    %cst_20 = arith.constant dense<0.000000e+00> : vector<8x1xf32>
    %37 = tpu.matmul %35, %36, %cst_20 {dimension_numbers = #tpu.dot_dimension_numbers<[1], [0], [0], [1], [0, 0, 1, 1], [], []>} : vector<8x128xf32>, vector<128x1xf32>, vector<8x1xf32> -> vector<8x1xf32>
    %c0_21 = arith.constant 0 : index
    %c0_22 = arith.constant 0 : index
    %38 = vector.load %arg7[%c0_21, %c0_22] : memref<8x1xf32, #tpu.memory_space<vmem>>, vector<8x1xf32>
    tpu.vector_store %arg7[%c0_21, %c0_22], %37 {strides = array<i32>} : memref<8x1xf32, #tpu.memory_space<vmem>>, vector<8x1xf32>,
    return
  }
  func.func @transform_0(%arg0: i32) -> (i32, i32) {
    %c0_i32 = arith.constant 0 : i32
    %c0_i32_0 = arith.constant 0 : i32
    return %arg0, %c0_i32 : i32, i32
  }
  func.func @transform_1(%arg0: i32) -> (i32, i32) {
    %c0_i32 = arith.constant 0 : i32
    %c0_i32_0 = arith.constant 0 : i32
    %c0_i32_1 = arith.constant 0 : i32
    return %c0_i32, %c0_i32_0 : i32, i32
  }
  func.func @transform_2(%arg0: i32) -> (i32, i32) {
    %c0_i32 = arith.constant 0 : i32
    %c0_i32_0 = arith.constant 0 : i32
    %c0_i32_1 = arith.constant 0 : i32
    return %c0_i32, %c0_i32_0 : i32, i32
  }
  func.func @transform_3(%arg0: i32) -> (i32, i32) {
    %c0_i32 = arith.constant 0 : i32
    %c0_i32_0 = arith.constant 0 : i32
    %c0_i32_1 = arith.constant 0 : i32
    return %c0_i32, %c0_i32_0 : i32, i32
  }
  func.func @transform_4(%arg0: i32) -> (i32, i32) {
    %c0_i32 = arith.constant 0 : i32
    %c0_i32_0 = arith.constant 0 : i32
    %c0_i32_1 = arith.constant 0 : i32
    return %c0_i32, %c0_i32_0 : i32, i32
  }
  func.func @transform_5(%arg0: i32) -> (i32, i32) {
    %c0_i32 = arith.constant 0 : i32
    %c0_i32_0 = arith.constant 0 : i32
    %c0_i32_1 = arith.constant 0 : i32
    return %c0_i32, %c0_i32_0 : i32, i32
  }
  func.func @transform_6(%arg0: i32) -> (i32, i32) {
    %c0_i32 = arith.constant 0 : i32
    %c0_i32_0 = arith.constant 0 : i32
    return %arg0, %c0_i32 : i32, i32
  }
}

</mosaic_0001>

<bundles_post_ra>
// kernel: tpu_custom_call.1
= control target key start
LH: loop header
LB: loop body
LE: loop exit
PB: predicated region body
PF: predicated region fallthrough
CT: control target
= control target key end

     0   :  { %11 = vsyncpa [#allocation3], 0  ;;  %s781_s21 = smov [#allocation2]   ;;  %s959_s0 = inlined_call_operand.vmem [shape: f32[8,16], index: 0, kind: input, shape index: {}]   ;;  %s960_s1 = inlined_call_operand.vmem [shape: f32[16,640], index: 1, kind: input, shape index: {}]   ;;  %s961_s2 = inlined_call_operand.vmem [shape: f32[1,640], index: 2, kind: input, shape index: {}]   ;;  %s962_s3 = inlined_call_operand.hbm [shape: f32[384,128], index: 3, kind: input, shape index: {}]   ;;  %s963_s4 = inlined_call_operand.vmem [shape: f32[1,128], index: 4, kind: input, shape index: {}]   ;;  %s964_s5 = inlined_call_operand.vmem [shape: f32[128,1], index: 5, kind: input, shape index: {}]   ;;  %s965_s6 = inlined_call_operand.vmem [shape: f32[8,1], index: 6, kind: output, shape index: {}]  }
   0x1   :  { %s23_s22 = sshll.u32 %s781_s21, 4  ;;  %s24_s22 = int_to_ptr.vmem [resolvable:$true] %s23_s22 }
   0x2   :  { %s767_s23 = scalar_lea.vmem %s24_s22, 6144  ;;  %p772_p1 = scmp.lt.s32.totalorder %s24_s22, %s24_s22 }
   0x3   :  { %p768_p0 = scmp.ne.s32.totalorder %s24_s22, %s767_s23  ;;  %p773_p2 = scmp.lt.s32.totalorder %s767_s23, %s767_s23 }
   0x5   :  { %p774_p3 = por %p773_p2, %p772_p1 }
   0x7   :  { %p775_p4 = pnand %p774_p3, %p768_p0 }
   0x9   :  { %778 = shalt.err (!%p775_p4)
}
   0xa   :  { %s782_s24 = smov 128   ;;  %s783_s25 = smov 8  }
   0xb   :  { %29 = dma.hbm_to_vmem [thread:$0]  %s962_s3, 6144, %s24_s22, [#allocation3], %s782_s24, %s782_s24, %s783_s25  }
   0xc   :  { %779 = dma.done.wait [#allocation3], 6144  }
   0xd   :  { %780 = vsyncadd [#allocation3], 4294961152  ;;  %v784_v0 = vmov 0.0   ;;  %vm785_vm0 = vmmov 0   ;;  %v44_v1 = vld [vmem:[%s960_s1 + $0x30] sm:$0xff]  ;;  %v43_v2 = vld [vmem:[%s960_s1 + $0x28] sm:$0xff]  ;;  %v50_v60 = vlaneseq }
   0xe   :  { %143 = vmatprep.mubr.f32.mxu0 %v784_v0  ;;  %676 = vmatprep.subr.mxu1 %v784_v0  ;;  %v39_v3 = vld [vmem:[%s960_s1 + $0x8] sm:$0xff]  ;;  %v38_v4 = vld [vmem:[%s960_s1] sm:$0xff]  ;;  %vm75_vm1 = vcmask 130048   ;;  %v45_v7 = vld [vmem:[%s960_s1 + $0x38] sm:$0xff]  ;;  %vm586_vm2 = vcmask 7168  }
   0xf   :  { %708 = vmatprep.mubr.msk.f32.mxu1 %vm785_vm0, %v784_v0  ;;  %107 = vmatprep.subr.mxu0 %v44_v1  ;;  %v37_v5 = vld [vmem:[%s959_s0] sm:$0xff]  ;;  %v41_v8 = vld [vmem:[%s960_s1 + $0x18] sm:$0xff]  ;;  %v40_v9 = vld [vmem:[%s960_s1 + $0x10] sm:$0xff]  ;;  %v51_v61 = vshrl.u32 %v50_v60, 7 }
  0x10   :  { %108 = vmatpush1.msra.mxu0 %v43_v2  ;;  %v46_v6 = vld [vmem:[%s960_s1 + $0x40] sm:$0xff]  ;;  %v47_v10 = vld [vmem:[%s960_s1 + $0x48] sm:$0xff]  ;;  %v334_v12 = vld [vmem:[#allocation2 + $0xf8] sm:$0xff] }
  0x11   :  { %109 = vmatprep.subr.mxu0 %v39_v3  ;;  %v42_v11 = vld [vmem:[%s960_s1 + $0x20] sm:$0xff]  ;;  %v318_v13 = vld [vmem:[#allocation2 + $0x78] sm:$0xff]  ;;  %v333_v14 = vld [vmem:[#allocation2 + $0xf0] sm:$0xff]  ;;  %v52_v62 = vsub.s32 0, %v51_v61  ;;  %v56_v1 = vsub.s32 1, %v51_v61  ;;  %v60_v2 = vsub.s32 2, %v51_v61 }
  0x12   :  { %110 = vmatpush1.msra.mxu0 %v38_v4  ;;  %v317_v15 = vld [vmem:[#allocation2 + $0x70] sm:$0xff]  ;;  %v332_v16 = vld [vmem:[#allocation2 + $0xe8] sm:$0xff]  ;;  %v331_v18 = vld [vmem:[#allocation2 + $0xe0] sm:$0xff] }
  0x13   :  { %593 = vmatmul.mubr.msk.f32.vlgmr.msra.gmra.mxu0 %vm75_vm1, %v37_v5  ;;  %178 = vmatprep.subr.mxu0 %v46_v6  ;;  %v316_v17 = vld [vmem:[#allocation2 + $0x68] sm:$0xff]  ;;  %v315_v19 = vld [vmem:[#allocation2 + $0x60] sm:$0xff]  ;;  %v330_v20 = vld [vmem:[#allocation2 + $0xd8] sm:$0xff] }
  0x14   :  { %179 = vmatpush1.msra.mxu0 %v45_v7  ;;  %214 = vmatprep.mubr.f32.mxu0 %v784_v0  ;;  %v314_v21 = vld [vmem:[#allocation2 + $0x58] sm:$0xff]  ;;  %v329_v22 = vld [vmem:[#allocation2 + $0xd0] sm:$0xff]  ;;  %v328_v24 = vld [vmem:[#allocation2 + $0xc8] sm:$0xff] }
  0x15   :  { %180 = vmatprep.subr.mxu0 %v41_v8  ;;  %v313_v23 = vld [vmem:[#allocation2 + $0x50] sm:$0xff]  ;;  %v312_v25 = vld [vmem:[#allocation2 + $0x48] sm:$0xff]  ;;  %v327_v26 = vld [vmem:[#allocation2 + $0xc0] sm:$0xff] }
  0x16   :  { %181 = vmatpush1.msra.mxu0 %v40_v9  ;;  %v311_v27 = vld [vmem:[#allocation2 + $0x40] sm:$0xff]  ;;  %v326_v28 = vld [vmem:[#allocation2 + $0xb8] sm:$0xff]  ;;  %v325_v30 = vld [vmem:[#allocation2 + $0xb0] sm:$0xff] }
  0x17   :  { %594 = vmatmul.mubr.msk.f32.vlgmr.msra.gmra.mxu0 %vm75_vm1, %v37_v5  ;;  %669 = vmatprep.subr.mxu0 %v784_v0  ;;  %v310_v29 = vld [vmem:[#allocation2 + $0x38] sm:$0xff]  ;;  %v309_v31 = vld [vmem:[#allocation2 + $0x30] sm:$0xff]  ;;  %v324_v32 = vld [vmem:[#allocation2 + $0xa8] sm:$0xff] }
  0x18   :  { %670 = vmatpush3.msra.mxu0 %v47_v10  ;;  %673 = vmatprep.mubr.msk.f32.mxu0 %vm785_vm0, %v784_v0  ;;  %v308_v33 = vld [vmem:[#allocation2 + $0x28] sm:$0xff]  ;;  %v323_v34 = vld [vmem:[#allocation2 + $0xa0] sm:$0xff]  ;;  %v322_v36 = vld [vmem:[#allocation2 + $0x98] sm:$0xff] }
  0x19   :  { %671 = vmatprep.subr.mxu0 %v784_v0  ;;  %v307_v35 = vld [vmem:[#allocation2 + $0x20] sm:$0xff]  ;;  %v306_v37 = vld [vmem:[#allocation2 + $0x18] sm:$0xff]  ;;  %v321_v38 = vld [vmem:[#allocation2 + $0x90] sm:$0xff] }
  0x1a   :  { %672 = vmatpush3.msra.mxu0 %v42_v11  ;;  %v305_v39 = vld [vmem:[#allocation2 + $0x10] sm:$0xff]  ;;  %v320_v40 = vld [vmem:[#allocation2 + $0x88] sm:$0xff]  ;;  %v319_v42 = vld [vmem:[#allocation2 + $0x80] sm:$0xff] }
  0x1b   :  { %674 = vmatmul.mubr.msk.f32.vlgmr.msra.gmra.mxu0 %vm75_vm1, %v37_v5  ;;  %617 = vmatprep.subr.mxu0 %v334_v12  ;;  %v304_v41 = vld [vmem:[#allocation2 + $0x8] sm:$0xff]  ;;  %v303_v43 = vld [vmem:[#allocation2] sm:$0xff]  ;;  %v350_v44 = vld [vmem:[#allocation2 + $0x178] sm:$0xff]  ;;  %v64_v5 = vsub.s32 3, %v51_v61 }
  0x1c   :  { %618 = vmatpush3.msra.mxu0 %v318_v13  ;;  %677 = vmatpush3.msra.mxu1 %v350_v44  ;;  %v349_v45 = vld [vmem:[#allocation2 + $0x170] sm:$0xff]  ;;  %v348_v46 = vld [vmem:[#allocation2 + $0x168] sm:$0xff]  ;;  %v347_v47 = vld [vmem:[#allocation2 + $0x160] sm:$0xff] }
  0x1d   :  { %619 = vmatprep.subr.mxu0 %v333_v14  ;;  %678 = vmatprep.subr.mxu1 %v784_v0  ;;  %v346_v48 = vld [vmem:[#allocation2 + $0x158] sm:$0xff]  ;;  %v345_v49 = vld [vmem:[#allocation2 + $0x150] sm:$0xff]  ;;  %v344_v50 = vld [vmem:[#allocation2 + $0x148] sm:$0xff] }
  0x1e   :  { %620 = vmatpush3.msra.mxu0 %v317_v15  ;;  %679 = vmatpush3.msra.mxu1 %v349_v45  ;;  %v343_v51 = vld [vmem:[#allocation2 + $0x140] sm:$0xff]  ;;  %v342_v52 = vld [vmem:[#allocation2 + $0x138] sm:$0xff]  ;;  %v341_v53 = vld [vmem:[#allocation2 + $0x130] sm:$0xff]  ;;  %v68_v15 = vsub.s32 4, %v51_v61 }
  0x1f   :  { %621 = vmatprep.subr.mxu0 %v332_v16  ;;  %680 = vmatprep.subr.mxu1 %v784_v0  ;;  %v340_v54 = vld [vmem:[#allocation2 + $0x128] sm:$0xff]  ;;  %v339_v55 = vld [vmem:[#allocation2 + $0x120] sm:$0xff]  ;;  %v338_v56 = vld [vmem:[#allocation2 + $0x118] sm:$0xff] }
  0x20   :  { %622 = vmatpush3.msra.mxu0 %v316_v17  ;;  %681 = vmatpush3.msra.mxu1 %v348_v46  ;;  %v337_v57 = vld [vmem:[#allocation2 + $0x110] sm:$0xff]  ;;  %v336_v58 = vld [vmem:[#allocation2 + $0x108] sm:$0xff]  ;;  %v335_v59 = vld [vmem:[#allocation2 + $0x100] sm:$0xff] }
  0x21   :  { %623 = vmatprep.subr.mxu0 %v331_v18  ;;  %682 = vmatprep.subr.mxu1 %v784_v0  ;;  %v48_v63 = vld [vmem:[%s961_s2] sm:$0x1f]  ;;  %v503_v45 = vld [vmem:[%s964_s5 + $0x18] sm:$0xff]  ;;  %v502_v46 = vld [vmem:[%s964_s5 + $0x10] sm:$0xff] }
  0x22   :  { %624 = vmatpush3.msra.mxu0 %v315_v19  ;;  %683 = vmatpush3.msra.mxu1 %v347_v47  ;;  %v53_v3 = vrot.slane %v48_v63, %v52_v62  ;;  %v57_v4 = vrot.slane %v48_v63, %v56_v1  ;;  %v61_v7 = vrot.slane %v48_v63, %v60_v2  ;;  %v504_v44 = vld [vmem:[%s964_s5 + $0x20] sm:$0xff]  ;;  %v501_v47 = vld [vmem:[%s964_s5 + $0x8] sm:$0xff] }
  0x23   :  { %625 = vmatprep.subr.mxu0 %v330_v20  ;;  %684 = vmatprep.subr.mxu1 %v784_v0  ;;  %v65_v11 = vrot.slane %v48_v63, %v64_v5  ;;  %v69_v20 = vrot.slane %v48_v63, %v68_v15 }
  0x24   :  { %626 = vmatpush3.msra.mxu0 %v314_v21  ;;  %685 = vmatpush3.msra.mxu1 %v346_v48  ;;  %v500_v48 = vld [vmem:[%s964_s5] sm:$0xff] }
  0x25   :  { %627 = vmatprep.subr.mxu0 %v329_v22  ;;  %686 = vmatprep.subr.mxu1 %v784_v0 }
  0x26   :  { %628 = vmatpush3.msra.mxu0 %v313_v23  ;;  %687 = vmatpush3.msra.mxu1 %v345_v49 }
  0x27   :  { %629 = vmatprep.subr.mxu0 %v328_v24  ;;  %688 = vmatprep.subr.mxu1 %v784_v0 }
  0x28   :  { %630 = vmatpush3.msra.mxu0 %v312_v25  ;;  %689 = vmatpush3.msra.mxu1 %v344_v50 }
  0x29   :  { %631 = vmatprep.subr.mxu0 %v327_v26  ;;  %690 = vmatprep.subr.mxu1 %v784_v0 }
  0x2a   :  { %632 = vmatpush3.msra.mxu0 %v311_v27  ;;  %691 = vmatpush3.msra.mxu1 %v343_v51 }
  0x2b   :  { %633 = vmatprep.subr.mxu0 %v326_v28  ;;  %692 = vmatprep.subr.mxu1 %v784_v0 }
  0x2c   :  { %634 = vmatpush3.msra.mxu0 %v310_v29  ;;  %693 = vmatpush3.msra.mxu1 %v342_v52 }
  0x2d   :  { %635 = vmatprep.subr.mxu0 %v325_v30  ;;  %694 = vmatprep.subr.mxu1 %v784_v0 }
  0x2e   :  { %636 = vmatpush3.msra.mxu0 %v309_v31  ;;  %695 = vmatpush3.msra.mxu1 %v341_v53  ;;  %v596_v53 = vld [vmem:[%s963_s4] ss:$0 sm:$0xff] }
  0x2f   :  { %637 = vmatprep.subr.mxu0 %v324_v32  ;;  %696 = vmatprep.subr.mxu1 %v784_v0 }
  0x30   :  { %638 = vmatpush3.msra.mxu0 %v308_v33  ;;  %697 = vmatpush3.msra.mxu1 %v340_v54  ;;  %v515_v33 = vld [vmem:[%s964_s5 + $0x78] sm:$0xff] }
  0x31   :  { %639 = vmatprep.subr.mxu0 %v323_v34  ;;  %698 = vmatprep.subr.mxu1 %v784_v0  ;;  %v514_v34 = vld [vmem:[%s964_s5 + $0x70] sm:$0xff] }
  0x32   :  { %640 = vmatpush3.msra.mxu0 %v307_v35  ;;  %699 = vmatpush3.msra.mxu1 %v339_v55  ;;  %v513_v35 = vld [vmem:[%s964_s5 + $0x68] sm:$0xff] }
  0x33   :  { %641 = vmatprep.subr.mxu0 %v322_v36  ;;  %700 = vmatprep.subr.mxu1 %v784_v0  ;;  %v512_v36 = vld [vmem:[%s964_s5 + $0x60] sm:$0xff] }
  0x34   :  { %642 = vmatpush3.msra.mxu0 %v306_v37  ;;  %701 = vmatpush3.msra.mxu1 %v338_v56  ;;  %v511_v37 = vld [vmem:[%s964_s5 + $0x58] sm:$0xff] }
  0x35   :  { %643 = vmatprep.subr.mxu0 %v321_v38  ;;  %702 = vmatprep.subr.mxu1 %v784_v0  ;;  %v510_v38 = vld [vmem:[%s964_s5 + $0x50] sm:$0xff] }
  0x36   :  { %644 = vmatpush3.msra.mxu0 %v305_v39  ;;  %703 = vmatpush3.msra.mxu1 %v337_v57  ;;  %v509_v39 = vld [vmem:[%s964_s5 + $0x48] sm:$0xff] }
  0x37   :  { %645 = vmatprep.subr.mxu0 %v320_v40  ;;  %704 = vmatprep.subr.mxu1 %v784_v0  ;;  %v508_v40 = vld [vmem:[%s964_s5 + $0x40] sm:$0xff] }
  0x38   :  { %646 = vmatpush3.msra.mxu0 %v304_v41  ;;  %705 = vmatpush3.msra.mxu1 %v336_v58  ;;  %v507_v41 = vld [vmem:[%s964_s5 + $0x38] sm:$0xff] }
  0x39   :  { %647 = vmatprep.subr.mxu0 %v319_v42  ;;  %706 = vmatprep.subr.mxu1 %v784_v0  ;;  %v506_v42 = vld [vmem:[%s964_s5 + $0x30] sm:$0xff] }
  0x3a   :  { %648 = vmatpush3.msra.mxu0 %v303_v43  ;;  %707 = vmatpush3.msra.mxu1 %v335_v59  ;;  %v505_v43 = vld [vmem:[%s964_s5 + $0x28] sm:$0xff] }
  0x3b   :  { %711 = vmatprep.subr.mxu1 %v784_v0 }
  0xd3   :  { %v145_v6 = vpop.f32.mrf.mxu0 }
  0xd4   :  { %v146_v8 = vadd.f32 %v145_v6, %v53_v3 }
  0xd5   :  { %v147_v9 = vpop.f32.mrf.mxu0 }
  0xd6   :  { %v148_v10 = vadd.f32 %v147_v9, %v57_v4  ;;  %v291_v16 = vmax.f32 %v146_v8, 0.0 }
  0xd7   :  { %v216_v12 = vpop.f32.mrf.mxu0 }
  0xd8   :  { %v292_v13 = vmax.f32 %v148_v10, 0.0  ;;  %v217_v14 = vadd.f32 %v216_v12, %v61_v7 }
  0xd9   :  { %v218_v17 = vpop.f32.mrf.mxu0 }
  0xda   :  { %751 = vtanh.f32 %v217_v14  ;;  %v219_v18 = vadd.f32 %v218_v17, %v65_v11  ;;  %485 = vmatprep.mubr.f32.mxu0 %v292_v13 }
  0xdb   :  { %486 = vmatmul.mubr.f32.vlgmr.msra.gmra.mxu0 %v291_v16  ;;  %v287_v19 = vpop.f32.mrf.mxu0 }
  0xdc   :  { %753 = vtanh.f32 %v219_v18  ;;  %v288_v22 = vadd.f32 %v287_v19, %v69_v20 }
  0xdd   :  { %v675_v21 = vpop.f32.mrf.mxu0 }
  0xde   :  { %755 = vtanh.f32 %v288_v22 }
  0xe7   :  { %v752_v23 = vpop.eup %751 }
  0xe8   :  { %v294_v24 = vmul.f32 0.5, %v752_v23 }
  0xe9   :  { %v754_v26 = vpop.eup %753 }
  0xea   :  { %v295_v25 = vadd.f32 0.5, %v294_v24 }
  0xeb   :  { %v756_v28 = vpop.eup %755 }
  0xec   :  { %v300_v27 = vmul.f32 %v754_v26, %v295_v25  ;;  %v298_v29 = vmul.f32 0.5, %v756_v28 }
  0xee   :  { %757 = vtanh.f32 %v300_v27  ;;  %v299_v30 = vadd.f32 0.5, %v298_v29 }
  0xfb   :  { %v758_v31 = vpop.eup %757 }
  0xfc   :  { %v302_v32 = vmul.f32 %v758_v31, %v299_v30 }
  0xfe   :  { %709 = vmatmul.mubr.f32.vlgmr.msra.gmra.mxu1 %v302_v32 }
  0xff   :  { %743 = vmatprep.mubr.msk.f32.mxu1 %vm785_vm0, %v784_v0  ;;  %712 = vmatpush3.msra.mxu1 %v515_v33 }
 0x100   :  { %713 = vmatprep.subr.mxu1 %v784_v0 }
 0x101   :  { %714 = vmatpush3.msra.mxu1 %v514_v34 }
 0x102   :  { %715 = vmatprep.subr.mxu1 %v784_v0 }
 0x103   :  { %716 = vmatpush3.msra.mxu1 %v513_v35 }
 0x104   :  { %717 = vmatprep.subr.mxu1 %v784_v0 }
 0x105   :  { %718 = vmatpush3.msra.mxu1 %v512_v36 }
 0x106   :  { %719 = vmatprep.subr.mxu1 %v784_v0 }
 0x107   :  { %720 = vmatpush3.msra.mxu1 %v511_v37 }
 0x108   :  { %721 = vmatprep.subr.mxu1 %v784_v0 }
 0x109   :  { %722 = vmatpush3.msra.mxu1 %v510_v38 }
 0x10a   :  { %723 = vmatprep.subr.mxu1 %v784_v0 }
 0x10b   :  { %724 = vmatpush3.msra.mxu1 %v509_v39 }
 0x10c   :  { %725 = vmatprep.subr.mxu1 %v784_v0 }
 0x10d   :  { %726 = vmatpush3.msra.mxu1 %v508_v40 }
 0x10e   :  { %727 = vmatprep.subr.mxu1 %v784_v0 }
 0x10f   :  { %728 = vmatpush3.msra.mxu1 %v507_v41 }
 0x110   :  { %729 = vmatprep.subr.mxu1 %v784_v0 }
 0x111   :  { %730 = vmatpush3.msra.mxu1 %v506_v42 }
 0x112   :  { %731 = vmatprep.subr.mxu1 %v784_v0 }
 0x113   :  { %732 = vmatpush3.msra.mxu1 %v505_v43 }
 0x114   :  { %733 = vmatprep.subr.mxu1 %v784_v0 }
 0x115   :  { %734 = vmatpush3.msra.mxu1 %v504_v44 }
 0x116   :  { %735 = vmatprep.subr.mxu1 %v784_v0 }
 0x117   :  { %736 = vmatpush3.msra.mxu1 %v503_v45 }
 0x118   :  { %737 = vmatprep.subr.mxu1 %v784_v0 }
 0x119   :  { %738 = vmatpush3.msra.mxu1 %v502_v46 }
 0x11a   :  { %739 = vmatprep.subr.mxu1 %v784_v0 }
 0x11b   :  { %740 = vmatpush3.msra.mxu1 %v501_v47 }
 0x11c   :  { %741 = vmatprep.subr.mxu1 %v784_v0 }
 0x11d   :  { %742 = vmatpush3.msra.mxu1 %v500_v48 }
 0x19b   :  { %v649_v49 = vpop.f32.mrf.mxu0 }
 0x19d   :  { %v650_v50 = vpop.f32.mrf.mxu0 }
 0x19e   :  { %v651_v51 = vadd.f32 %v650_v50, %v649_v49 }
 0x1be   :  { %v417_v52 = vpop.f32.mrf.mxu1 }
 0x1bf   :  { %v488_v54 = vadd.f32 %v651_v51, %v417_v52 }
 0x1c0   :  { %v710_v55 = vpop.f32.mrf.mxu1 }
 0x1c1   :  { %v498_v56 = vadd.f32 %v596_v53, %v488_v54 }
 0x1c3   :  { %v499_v57 = vmax.f32 %v498_v56, 0.0 }
 0x1c5   :  { %744 = vmatmul.mubr.f32.vlgmr.msra.gmra.mxu1 %v499_v57 }
 0x285   :  { %v582_v0 = vpop.f32.mrf.mxu1 }
 0x286   :  { %587 = vst.msk [vmem:[%s965_s6] sm:$0xff] %vm586_vm2, %v582_v0 }
 0x287   :  { %v745_v58 = vpop.f32.mrf.mxu1 }
 0x288   :  { %592 = vsyncpa [#allocation3], 1 }

</bundles_post_ra>
